<compile_context>
chip_gen: v6e
topology: v6e:2x2x1
jax: 0.10.0
libtpu: 0.0.40
codegen_flags: <defaults>
</compile_context>

<pallas_src>
import functools

import jax
import jax.numpy as jnp
from jax.experimental import pallas as pl
from jax.experimental.pallas import tpu as pltpu

D_IN = 128    # fc1 input width (fixed by the module)
D_H1 = 128    # fc1 output / bn1 width
D_H2 = 64     # fc2 output / bn2 width
LANE = 128    # TPU lane width
BN_EPS = 1e-5


def _round_up(x, m):
    return (x + m - 1) // m * m


# ------------------------------- kernel ---------------------------------------
def affordance_kernel(z_ref, w_ref, s_ref, out_ref, *, num_affordances):
    """Fused fc1+bn1+relu -> fc2+bn2+relu -> fc3+sigmoid on one (TM, 128) row tile.

    z_ref:   (TM, 128)  f32 or bf16  activations, rows = flattened (batch * slots)
    w_ref:   (128, 384) bf16  packed weights [W1 | W2 zero-padded | W3 zero-padded]
    s_ref:   (8, 128)   f32   rows: b1, bn1_scale, bn1_shift, b2, bn2_scale,
                              bn2_shift, b3, (unused)
    out_ref: (TM, C)    f32   exact-width output (C = num_affordances)
    """
    C = num_affordances

    z = z_ref[...]
    if z.dtype != jnp.bfloat16:
        z = z.astype(jnp.bfloat16)

    b1    = s_ref[0:1, :]
    bn1_s = s_ref[1:2, :]
    bn1_o = s_ref[2:3, :]
    b2    = s_ref[3:4, :]
    bn2_s = s_ref[4:5, :]
    bn2_o = s_ref[5:6, :]
    b3    = s_ref[6:7, :C]

    w1 = w_ref[:, 0:128]
    w2 = w_ref[:, 128:256]
    w3 = w_ref[:, 256:384]

    # fc1 -> folded BatchNorm1d -> ReLU      (Dropout = identity at inference)
    x = jnp.dot(z, w1, preferred_element_type=jnp.float32) + b1
    x = jnp.maximum(x * bn1_s + bn1_o, 0.0)
    # fc2 (cols 64..127 zero-padded) -> folded BN -> ReLU; padded cols stay 0
    x = jnp.dot(x.astype(jnp.bfloat16), w2, preferred_element_type=jnp.float32) + b2
    x = jnp.maximum(x * bn2_s + bn2_o, 0.0)
    # fc3 (rows >= 64 zero-padded) -> sigmoid; keep only the C live columns
    x = jnp.dot(x.astype(jnp.bfloat16), w3, preferred_element_type=jnp.float32)
    out_ref[...] = jax.nn.sigmoid(x[:, :C] + b3)


# --------------------------- parameter packing ---------------------------------
def pack_affordance_params(p, num_affordances):
    """Fold BN into per-channel scale/shift and pack everything into two slabs."""
    C = num_affordances
    s1 = p['bn1_gamma'] / jnp.sqrt(p['bn1_var'] + BN_EPS)
    o1 = p['bn1_beta'] - p['bn1_mean'] * s1
    s2 = p['bn2_gamma'] / jnp.sqrt(p['bn2_var'] + BN_EPS)
    o2 = p['bn2_beta'] - p['bn2_mean'] * s2

    # Zero-pad fc2 / fc3 to full 128-lane width so every matmul is lane-dense.
    w2p = jnp.zeros((D_H1, LANE), jnp.float32).at[:, :D_H2].set(p['w2'])
    w3p = jnp.zeros((LANE, LANE), jnp.float32).at[:D_H2, :C].set(p['w3'])
    w_slab = jnp.concatenate([p['w1'], w2p, w3p], axis=1).astype(jnp.bfloat16)  # (128, 384)

    def row(v, n):
        return jnp.zeros((LANE,), jnp.float32).at[:n].set(v)

    s_slab = jnp.stack([
        row(p['b1'], D_H1),
        row(s1, D_H1),
        row(o1, D_H1),
        row(p['b2'], D_H2),
        row(s2, D_H2),
        row(o2, D_H2),
        row(p['b3'], C),
        jnp.zeros((LANE,), jnp.float32),
    ], axis=0)                                                                   # (8, 128)
    return w_slab, s_slab


# ------------------------------- wrapper ---------------------------------------
@functools.partial(jax.jit, static_argnames=('num_affordances',))
def affordance_classifier_fwd(z, w_slab, s_slab, num_affordances):
    B, S, _ = z.shape
    M = B * S
    zf = z.reshape(M, D_IN)                   # free view, no extra HBM pass

    # Big row tiles for HBM bandwidth, but always >= 2 grid steps so the
    # "parallel" axis shards across v7x's two TensorCores.
    half = _round_up(-(-M // 2), 8)           # round_up(ceil(M/2), 8)
    TM = max(8, min(1024, half))
    grid = pl.cdiv(M, TM)                     # ragged last block handled by Pallas

    kernel = functools.partial(affordance_kernel, num_affordances=num_affordances)

    out = pl.pallas_call(
        kernel,
        grid=(grid,),
        in_specs=[
            pl.BlockSpec((TM, D_IN), lambda i: (i, 0)),
            pl.BlockSpec((D_IN, 3 * LANE), lambda i: (0, 0)),   # resident weights
            pl.BlockSpec((8, LANE), lambda i: (0, 0)),          # resident bias/BN rows
        ],
        out_specs=pl.BlockSpec((TM, num_affordances), lambda i: (i, 0)),
        out_shape=jax.ShapeDtypeStruct((M, num_affordances), jnp.float32),
        compiler_params=pltpu.CompilerParams(
            dimension_semantics=("parallel",)),
    )(zf, w_slab, s_slab)

    return out.reshape(B, S, num_affordances)


# ------------------------------ reference --------------------------------------
def affordance_classifier_ref(z, p, num_affordances):
    """Pure-JAX f32 reference with identical (eval-mode) semantics."""
    s1 = p['bn1_gamma'] / jnp.sqrt(p['bn1_var'] + BN_EPS)
    o1 = p['bn1_beta'] - p['bn1_mean'] * s1
    s2 = p['bn2_gamma'] / jnp.sqrt(p['bn2_var'] + BN_EPS)
    o2 = p['bn2_beta'] - p['bn2_mean'] * s2
    x = z @ p['w1'] + p['b1']
    x = jnp.maximum(x * s1 + o1, 0.0)
    x = x @ p['w2'] + p['b2']
    x = jnp.maximum(x * s2 + o2, 0.0)
    x = x @ p['w3'] + p['b3']
    return jax.nn.sigmoid(x)


# ------------------------------- params ----------------------------------------
def init_params(key, num_affordances):
    ks = jax.random.split(key, 16)

    def nrm(k, shape, s):
        return (jax.random.normal(k, shape) * s).astype(jnp.float32)

    # Linear weights stored as (in, out); transpose when porting PyTorch (out, in).
    # TODO(synk): Dropout / training-mode batch statistics are not modelled
    # (inference semantics: Dropout=identity, BN uses running stats).
    return {
        'w1': nrm(ks[0], (D_IN, D_H1), 0.05),
        'b1': nrm(ks[1], (D_H1,), 0.02),
        'w2': nrm(ks[2], (D_H1, D_H2), 0.05),
        'b2': nrm(ks[3], (D_H2,), 0.02),
        'w3': nrm(ks[4], (D_H2, num_affordances), 0.05),
        'b3': nrm(ks[5], (num_affordances,), 0.02),
        'bn1_gamma': 1.0 + nrm(ks[6], (D_H1,), 0.1),
        'bn1_beta': nrm(ks[7], (D_H1,), 0.1),
        'bn1_mean': nrm(ks[8], (D_H1,), 0.1),
        'bn1_var': jnp.abs(nrm(ks[9], (D_H1,), 0.2)) + 0.5,
        'bn2_gamma': 1.0 + nrm(ks[10], (D_H2,), 0.1),
        'bn2_beta': nrm(ks[11], (D_H2,), 0.1),
        'bn2_mean': nrm(ks[12], (D_H2,), 0.1),
        'bn2_var': jnp.abs(nrm(ks[13], (D_H2,), 0.2)) + 0.5,
    }


# ------------------------------- main -------------------------------------------
if __name__ == "__main__":
    B, S, C = 2, 8, 8        # batch, num slots, num_affordances
    key = jax.random.PRNGKey(0)
    kp, kz = jax.random.split(key)

    params = init_params(kp, num_affordances=C)
    z = jax.random.normal(kz, (B, S, D_IN), dtype=jnp.float32)

    w_slab, s_slab = pack_affordance_params(params, C)
    out = affordance_classifier_fwd(z, w_slab, s_slab, num_affordances=C)
    out = jax.block_until_ready(out)

    assert out.shape == (B, S, C)
    assert bool(jnp.all(jnp.isfinite(out)))
    assert bool(jnp.all((out >= 0.0) & (out <= 1.0)))

    ref = affordance_classifier_ref(z, params, C)
    max_err = float(jnp.max(jnp.abs(out - ref)))
    assert max_err < 5e-2, f"max abs error vs f32 reference too large: {max_err}"

    print("KERNEL_OK")
</pallas_src>

<mosaic_0001>
module attributes {stable_mosaic.version = 11 : i64} {
  func.func @affordance_kernel(%arg0: i32, %arg1: memref<8x128xf32, #tpu.memory_space<vmem>>, %arg2: memref<128x384xbf16, #tpu.memory_space<vmem>>, %arg3: memref<8x128xf32, #tpu.memory_space<vmem>>, %arg4: memref<8x8xf32, #tpu.memory_space<vmem>>) attributes {dimension_semantics = [#tpu.dimension_semantics<parallel>], iteration_bounds = array<i64: 2>, scalar_prefetch = 0 : i64, scratch_operands = 0 : i64, tpu.core_type = #tpu.core_type<tc>, window_params = [{transform_indices = @transform_0, window_bounds = array<i64: 8, 128>}, {pipeline_mode = #tpu.pipeline_mode<synchronous>, transform_indices = @transform_1, window_bounds = array<i64: 128, 384>}, {pipeline_mode = #tpu.pipeline_mode<synchronous>, transform_indices = @transform_2, window_bounds = array<i64: 8, 128>}, {transform_indices = @transform_3, window_bounds = array<i64: 8, 8>}]} {
    %c0 = arith.constant 0 : index
    %c0_0 = arith.constant 0 : index
    %0 = vector.load %arg1[%c0, %c0_0] : memref<8x128xf32, #tpu.memory_space<vmem>>, vector<8x128xf32>
    %1 = arith.truncf %0 : vector<8x128xf32> to vector<8x128xbf16>
    %c0_1 = arith.constant 0 : index
    %c0_2 = arith.constant 0 : index
    %2 = vector.load %arg3[%c0_1, %c0_2] : memref<8x128xf32, #tpu.memory_space<vmem>>, vector<1x128xf32>
    %c1 = arith.constant 1 : index
    %c0_3 = arith.constant 0 : index
    %3 = vector.load %arg3[%c1, %c0_3] : memref<8x128xf32, #tpu.memory_space<vmem>>, vector<1x128xf32>
    %c2 = arith.constant 2 : index
    %c0_4 = arith.constant 0 : index
    %4 = vector.load %arg3[%c2, %c0_4] : memref<8x128xf32, #tpu.memory_space<vmem>>, vector<1x128xf32>
    %c3 = arith.constant 3 : index
    %c0_5 = arith.constant 0 : index
    %5 = vector.load %arg3[%c3, %c0_5] : memref<8x128xf32, #tpu.memory_space<vmem>>, vector<1x128xf32>
    %c4 = arith.constant 4 : index
    %c0_6 = arith.constant 0 : index
    %6 = vector.load %arg3[%c4, %c0_6] : memref<8x128xf32, #tpu.memory_space<vmem>>, vector<1x128xf32>
    %c5 = arith.constant 5 : index
    %c0_7 = arith.constant 0 : index
    %7 = vector.load %arg3[%c5, %c0_7] : memref<8x128xf32, #tpu.memory_space<vmem>>, vector<1x128xf32>
    %c6 = arith.constant 6 : index
    %c0_8 = arith.constant 0 : index
    %8 = vector.load %arg3[%c6, %c0_8] : memref<8x128xf32, #tpu.memory_space<vmem>>, vector<1x8xf32>
    %c0_9 = arith.constant 0 : index
    %c0_10 = arith.constant 0 : index
    %9 = vector.load %arg2[%c0_9, %c0_10] : memref<128x384xbf16, #tpu.memory_space<vmem>>, vector<128x128xbf16>
    %c0_11 = arith.constant 0 : index
    %c128 = arith.constant 128 : index
    %10 = vector.load %arg2[%c0_11, %c128] : memref<128x384xbf16, #tpu.memory_space<vmem>>, vector<128x128xbf16>
    %c0_12 = arith.constant 0 : index
    %c256 = arith.constant 256 : index
    %11 = vector.load %arg2[%c0_12, %c256] : memref<128x384xbf16, #tpu.memory_space<vmem>>, vector<128x128xbf16>
    %cst = arith.constant dense<0.000000e+00> : vector<8x128xf32>
    %12 = tpu.matmul %1, %9, %cst {dimension_numbers = #tpu.dot_dimension_numbers<[1], [0], [0], [1], [0, 0, 1, 1], [], []>} : vector<8x128xbf16>, vector<128x128xbf16>, vector<8x128xf32> -> vector<8x128xf32>
    %13 = vector.broadcast %2 : vector<1x128xf32> to vector<8x128xf32>
    %14 = arith.addf %12, %13 : vector<8x128xf32>
    %15 = vector.broadcast %3 : vector<1x128xf32> to vector<8x128xf32>
    %16 = arith.mulf %14, %15 : vector<8x128xf32>
    %17 = vector.broadcast %4 : vector<1x128xf32> to vector<8x128xf32>
    %18 = arith.addf %16, %17 : vector<8x128xf32>
    %cst_13 = arith.constant 0.000000e+00 : f32
    %19 = vector.broadcast %cst_13 : f32 to vector<8x128xf32>
    %20 = arith.maximumf %18, %19 : vector<8x128xf32>
    %21 = arith.truncf %20 : vector<8x128xf32> to vector<8x128xbf16>
    %cst_14 = arith.constant dense<0.000000e+00> : vector<8x128xf32>
    %22 = tpu.matmul %21, %10, %cst_14 {dimension_numbers = #tpu.dot_dimension_numbers<[1], [0], [0], [1], [0, 0, 1, 1], [], []>} : vector<8x128xbf16>, vector<128x128xbf16>, vector<8x128xf32> -> vector<8x128xf32>
    %23 = vector.broadcast %5 : vector<1x128xf32> to vector<8x128xf32>
    %24 = arith.addf %22, %23 : vector<8x128xf32>
    %25 = vector.broadcast %6 : vector<1x128xf32> to vector<8x128xf32>
    %26 = arith.mulf %24, %25 : vector<8x128xf32>
    %27 = vector.broadcast %7 : vector<1x128xf32> to vector<8x128xf32>
    %28 = arith.addf %26, %27 : vector<8x128xf32>
    %cst_15 = arith.constant 0.000000e+00 : f32
    %29 = vector.broadcast %cst_15 : f32 to vector<8x128xf32>
    %30 = arith.maximumf %28, %29 : vector<8x128xf32>
    %31 = arith.truncf %30 : vector<8x128xf32> to vector<8x128xbf16>
    %cst_16 = arith.constant dense<0.000000e+00> : vector<8x128xf32>
    %32 = tpu.matmul %31, %11, %cst_16 {dimension_numbers = #tpu.dot_dimension_numbers<[1], [0], [0], [1], [0, 0, 1, 1], [], []>} : vector<8x128xbf16>, vector<128x128xbf16>, vector<8x128xf32> -> vector<8x128xf32>
    %33 = vector.extract_strided_slice %32 {offsets = [0, 0], sizes = [8, 8], strides = [1, 1]} : vector<8x128xf32> to vector<8x8xf32>
    %34 = vector.broadcast %8 : vector<1x8xf32> to vector<8x8xf32>
    %35 = arith.addf %33, %34 : vector<8x8xf32>
    %36 = arith.negf %35 : vector<8x8xf32>
    %37 = math.exp %36 : vector<8x8xf32>
    %cst_17 = arith.constant 1.000000e+00 : f32
    %38 = vector.broadcast %cst_17 : f32 to vector<8x8xf32>
    %39 = arith.addf %38, %37 : vector<8x8xf32>
    %40 = arith.divf %38, %39 : vector<8x8xf32>
    %c0_18 = arith.constant 0 : index
    %c0_19 = arith.constant 0 : index
    %41 = vector.load %arg4[%c0_18, %c0_19] : memref<8x8xf32, #tpu.memory_space<vmem>>, vector<8x8xf32>
    tpu.vector_store %arg4[%c0_18, %c0_19], %40 {strides = array<i32>} : memref<8x8xf32, #tpu.memory_space<vmem>>, vector<8x8xf32>,
    return
  }
  func.func @transform_0(%arg0: i32) -> (i32, i32) {
    %c0_i32 = arith.constant 0 : i32
    %c0_i32_0 = arith.constant 0 : i32
    return %arg0, %c0_i32 : i32, i32
  }
  func.func @transform_1(%arg0: i32) -> (i32, i32) {
    %c0_i32 = arith.constant 0 : i32
    %c0_i32_0 = arith.constant 0 : i32
    %c0_i32_1 = arith.constant 0 : i32
    return %c0_i32, %c0_i32_0 : i32, i32
  }
  func.func @transform_2(%arg0: i32) -> (i32, i32) {
    %c0_i32 = arith.constant 0 : i32
    %c0_i32_0 = arith.constant 0 : i32
    %c0_i32_1 = arith.constant 0 : i32
    return %c0_i32, %c0_i32_0 : i32, i32
  }
  func.func @transform_3(%arg0: i32) -> (i32, i32) {
    %c0_i32 = arith.constant 0 : i32
    %c0_i32_0 = arith.constant 0 : i32
    return %arg0, %c0_i32 : i32, i32
  }
}

</mosaic_0001>

<bundles_post_ra>
// kernel: affordance_classifier_fwd.1
= control target key start
LH: loop header
LB: loop body
LE: loop exit
PB: predicated region body
PF: predicated region fallthrough
CT: control target
= control target key end

     0   :  { %8 = vsyncpa [#allocation3], 0  ;;  %s1303_s0 = inlined_call_operand.hbm [shape: f32[16,128], index: 0, kind: input, shape index: {}]   ;;  %s1304_s1 = inlined_call_operand.hbm [shape: bf16[128,384], index: 1, kind: input, shape index: {}]   ;;  %s1305_s2 = inlined_call_operand.hbm [shape: f32[8,128], index: 2, kind: input, shape index: {}]   ;;  %s1306_s3 = inlined_call_operand.hbm [shape: f32[16,8], index: 3, kind: output, shape index: {}]  }
   0x1   :  { %10 = vsyncpa [#allocation3 + $0x1], 0 }
   0x2   :  { %11 = vsyncpa [#allocation6], 0 }
   0x3   :  { %12 = vsyncpa [#allocation4], 0 }
   0x4   :  { %14 = vsyncpa [#allocation4 + $0x1], 0  ;;  %s1095_s12 = smov 0   ;;  %s1097_s13 = smov 0  }
   0x5   :  { %s1099_s14 = smov 0   ;;  %s1101_s15 = smov 0  }
   0x6 LB: > { %s1116_s16 = sadd.s32 4294967295, %s1065_s15   ;;  %s683_s17 = sadd.s32 4294967294, %s1065_s15   ;;  %s1065_s15 = sphi %s1101_s15, %s1328_s15   ;;  %s1061_s14 = sphi %s1099_s14, %s1327_s14   ;;  %s1057_s13 = sphi %s1097_s13, %s1326_s13   ;;  %s1053_s12 = sphi %s1095_s12, %s1325_s12  }
   0x7   : > { %p40_p0 = scmp.ne.s32.totalorder %s1057_s13, %s1053_s12  ;;  %p1307_p1 = scmp.eq.s32.totalorder %s1116_s16, 0 }
   0x8   : > { %p112_p3 = scmp.eq.s32.totalorder %s683_s17, 1  ;;  %p684_p5 = scmp.ge.s32.totalorder %s1065_s15, 1 }
   0x9   : > { %p1125_p4 = por %p1307_p1, %p40_p0  ;;  %p119_p7 = scmp.lt.s32.totalorder %s1065_s15, 3 }
   0xa   : > { %p1130_p6 = por %p112_p3, %p40_p0  ;;  %s1067_s21 = smov [#allocation5]  }
   0xb   : > { %s1311_s18 = scalar_select %p1125_p4, 1, 0 }
   0xc   : > { %s1312_s19 = scalar_select %p1130_p6, 1, 0 }
   0xd   : > { %p1135_p8 = pnand %p684_p5, %p119_p7  ;;  %s131_s22 = sshll.u32 %s1067_s21, 4  ;;  %s132_s22 = int_to_ptr.vmem [resolvable:$true] %s131_s22 }
   0xe   : > { %s1068_s24 = smov [#allocation7]   ;;  %s928_s26 = scalar_lea.vmem %s132_s22, 3072 }
   0xf   : > { %s1313_s20 = scalar_select %p1135_p8, 1, 0 }
  0x10   : > { %p830_p9 = pneg %p1135_p8  ;;  %s145_s25 = sshll.u32 %s1068_s24, 4  ;;  %s146_s25 = int_to_ptr.vmem [resolvable:$true] %s145_s25 }
  0x11   : > { %p929_p13 = scmp.ne.s32.totalorder %s132_s22, %s928_s26  ;;  %p936_p5 = scmp.lt.s32.totalorder %s132_s22, %s132_s22 }
  0x12   : > { %p1144_p11 = pnand %p830_p9, %p1307_p1  ;;  %p937_p7 = scmp.lt.s32.totalorder %s928_s26, %s928_s26 }
  0x14   : > { %p919_p12 = pneg %p1144_p11  ;;  %p938_p10 = por %p937_p7, %p936_p5 }
  0x16   : > { %p931_p0 = pnand %p929_p13, %p919_p12 }
  0x18   : > { %p932_p3 = pneg %p931_p0 }
  0x1a   : > { %p939_p9 = pnand %p938_p10, %p932_p3 }
  0x1c   : > { %942 = shalt.err (!%p939_p9)
}
  0x1d   : > { %s1069_s27 = smov 192   ;;  %s1070_s28 = smov 12  }
  0x1e   : > { %833 = dma.hbm_to_vmem [thread:$0]  (!%p1144_p11), %s1304_s1, 3072, %s132_s22, [#allocation6], %s1069_s27, %s1069_s27, %s1070_s28  }
  0x1f   : > { %s954_s4 = scalar_lea.vmem %s146_s25, 128  ;;  %p962_p2 = scmp.lt.s32.totalorder %s146_s25, %s146_s25 }
  0x20   : > { %p955_p1 = scmp.ne.s32.totalorder %s146_s25, %s954_s4  ;;  %p963_p6 = scmp.lt.s32.totalorder %s954_s4, %s954_s4 }
  0x22   : > { %p957_p13 = pnand %p955_p1, %p919_p12  ;;  %p964_p5 = por %p963_p6, %p962_p2 }
  0x24   : > { %p958_p0 = pneg %p957_p13 }
  0x26   : > { %p965_p10 = pnand %p964_p5, %p958_p0 }
  0x28   : > { %968 = shalt.err (!%p965_p10)
}
  0x29   : > { %836 = dma.hbm_to_vmem [thread:$0]  (!%p1144_p11), %s1305_s2, 128, %s146_s25, [#allocation6]  }
  0x2a   : > { %s1167_s7 = sadd.s32 1, %s1065_s15   ;;  %s27_s8 = sadd.s32 1, %s1061_s14 }
  0x2b   : > { %s24_s9 = ssub.s32 %s1065_s15, %s1167_s7  ;;  %p34_p1 = scmp.ne.s32.totalorder %s1061_s14, %s1057_s13 }
  0x2c   : > { %p25_p2 = scmp.eq.s32.totalorder %s24_s9, 0  ;;  %p35_p6 = scmp.eq.s32.totalorder %s1065_s15, 0 }
  0x2d   : > { %p1315_p12 = scmp.eq.s32.totalorder %s1116_s16, 1  ;;  %p847_p7 = scmp.lt.s32.totalorder %s1065_s15, 2 }
  0x2e   : > { %s1183_s11 = scalar_select %p25_p2, %s1061_s14, %s27_s8  }
  0x2f   : > { %p1177_p3 = por %p1315_p12, %p34_p1  ;;  %p36_p9 = por %p35_p6, %p34_p1 }
  0x30   : > { %s156_s17 = sand.u32 1, %s1061_s14   ;;  %s689_s22 = sshll.u32 %s1065_s15, 7 }
  0x31   : > { %s1316_s10 = scalar_select %p1177_p3, 1, 0 }
  0x32   : > { %s688_s21 = sshll.u32 %s156_s17, 3  ;;  %s1190_s25 = scalar_lea.hbm %s1303_s0, %s689_s22 }
  0x33   : > { %s160_s26 = scalar_lea.vmem [#allocation2], %s688_s21  ;;  %p1192_p11 = pnand %p847_p7, %p36_p9 }
  0x34   : > { %s167_s27 = sshll.u32 %s160_s26, 4  ;;  %s157_s29 = scalar_lea.sflag [#allocation3], %s156_s17  ;;  %s168_s27 = int_to_ptr.vmem [resolvable:$true] %s167_s27 }
  0x35   : > { %s969_s30 = scalar_lea.hbm %s1190_s25, 128  ;;  %p971_p0 = pneg %p1192_p11 }
  0x36   : > { %p970_p13 = scmp.ne.s32.totalorder %s1190_s25, %s969_s30  ;;  %s974_s6 = scalar_lea.hbm %s1303_s0, 256 }
  0x37   : > { %p975_p1 = scmp.lt.s32.totalorder %s1190_s25, %s1303_s0  ;;  %p976_p2 = scmp.lt.s32.totalorder %s974_s6, %s969_s30 }
  0x38   : > { %p972_p5 = pnand %p971_p0, %p970_p13 }
  0x39   : > { %p977_p6 = por %p976_p2, %p975_p1 }
  0x3a   : > { %p973_p10 = pneg %p972_p5 }
  0x3c   : > { %p978_p12 = pnand %p977_p6, %p973_p10 }
  0x3e   : > { %981 = shalt.err (!%p978_p12)
}
  0x3f   : > { %s982_s21 = scalar_lea.vmem %s168_s27, 128  ;;  %s1071_s17 = smov [#allocation2]  }
  0x40   : > { %p983_p7 = scmp.ne.s32.totalorder %s168_s27, %s982_s21  ;;  %s987_s22 = sshll.u32 %s1071_s17, 4  ;;  %s988_s22 = int_to_ptr.vmem [resolvable:$false] %s987_s22 }
  0x41   : > { %s989_s23 = scalar_lea.vmem %s988_s22, 256  ;;  %p990_p13 = scmp.lt.s32.totalorder %s168_s27, %s988_s22 }
  0x42   : > { %p985_p9 = pnand %p983_p7, %p971_p0  ;;  %p991_p5 = scmp.lt.s32.totalorder %s989_s23, %s982_s21 }
  0x44   : > { %p986_p3 = pneg %p985_p9  ;;  %p992_p4 = por %p991_p5, %p990_p13 }
  0x46   : > { %p993_p8 = pnand %p992_p4, %p986_p3 }
  0x48   : > { %996 = shalt.err (!%p993_p8)
}
  0x49   : > { %840 = dma.hbm_to_vmem [thread:$0]  (!%p1192_p11), %s1190_s25, 128, %s168_s27, %s157_s29  }
  0x4a   : > { %p1318_p10 = scmp.ne.s32.totalorder %s1313_s20, 0 }
  0x4b   : > { %s1213_s24 = sand.u32 (!%p1318_p10), 1, %s1057_s13   ;;  %p1319_p4 = scmp.ne.s32.totalorder (!%p1318_p10), %s1311_s18, 0 }
  0x4c   : > { %176 = sbr.rel (%p1318_p10) target bundleno = 765 (0x2fd), region = 32  ;;  %s691_s26 = sshll.u32 (!%p1318_p10), %s1213_s24, 3 }
  0x4d   : > { %s179_s30 = scalar_lea.sflag (!%p1318_p10), [#allocation3], %s1213_s24  ;;  %s1219_s4 = scalar_lea.vmem (!%p1318_p10), [#allocation2], %s691_s26 }
  0x51   : > { %1040 = dma.done.wait (%p1319_p4), %s179_s30, 128  }
  0x52   : > { %1042 = vsyncadd (%p1319_p4), %s179_s30, 4294967168  ;;  %p1320_p8 = scmp.eq.s32.totalorder %s1116_s16, 0 }
  0x54   : > { %1044 = dma.done.wait (%p1320_p8), [#allocation6], 3200   ;;  %p1321_p3 = pmov %p1320_p8 }
  0x55   : > { %v1072_v0 = vmov 0.0   ;;  %vm1073_vm0 = vmmov 0   ;;  %v889_v1 = vld [vmem:[#allocation5 + $0xa8] ss:$12 sps:$4 sm:$0xff]   ;;  %v890_v2 = vld [vmem:[#allocation5 + $0x90] ss:$12 sps:$4 sm:$0xff]  }
  0x56   : > { %1046 = vsyncadd (%p1321_p3), [#allocation6], 4294964096  ;;  %758 = vmatprep.subr.bf16.mxu0 %v1072_v0  ;;  %774 = vmatprep.mubr.msk.bf16.mxu0 %vm1073_vm0, %v1072_v0  ;;  %v891_v3 = vld [vmem:[#allocation5 + $0x78] ss:$12 sps:$4 sm:$0xff]   ;;  %v892_v5 = vld [vmem:[#allocation5 + $0x60] ss:$12 sps:$4 sm:$0xff]  }
  0x57   : > { %778 = vmatprep.subr.bf16.mxu1 %v1072_v0  ;;  %794 = vmatprep.mubr.msk.bf16.mxu1 %vm1073_vm0, %v1072_v0  ;;  %v897_v4 = vld [vmem:[#allocation5 + $0xac] ss:$12 sps:$4 sm:$0xff]   ;;  %v898_v6 = vld [vmem:[#allocation5 + $0x94] ss:$12 sps:$4 sm:$0xff]   ;;  %v899_v8 = vld [vmem:[#allocation5 + $0x7c] ss:$12 sps:$4 sm:$0xff]  }
  0x58   : > { %759 = vmatpush3.bf16.msra.mxu0 %v889_v1  ;;  %779 = vmatpush3.bf16.msra.mxu1 %v897_v4  ;;  %v893_v7 = vld [vmem:[#allocation5 + $0x48] ss:$12 sps:$4 sm:$0xff]   ;;  %v894_v9 = vld [vmem:[#allocation5 + $0x30] ss:$12 sps:$4 sm:$0xff]   ;;  %v895_v11 = vld [vmem:[#allocation5 + $0x18] ss:$12 sps:$4 sm:$0xff]  }
  0x59   : > { %760 = vmatprep.subr.bf16.mxu0 %v1072_v0  ;;  %780 = vmatprep.subr.bf16.mxu1 %v1072_v0  ;;  %v900_v10 = vld [vmem:[#allocation5 + $0x64] ss:$12 sps:$4 sm:$0xff]   ;;  %v901_v12 = vld [vmem:[#allocation5 + $0x4c] ss:$12 sps:$4 sm:$0xff]   ;;  %v902_v16 = vld [vmem:[#allocation5 + $0x34] ss:$12 sps:$4 sm:$0xff]  }
  0x5a   : > { %v896_v13 = vld [vmem:[#allocation5] ss:$12 sps:$4 sm:$0xff]   ;;  %v214_v14 = vld [vmem:[%s1219_s4] sm:$0xff]  ;;  %v715_v40 = vld [vmem:[#allocation7 + $0x4] ss:$0 sm:$0xff]  ;;  %s728_s18 = sshll.u32 %s1116_s16, 7 }
  0x5b   : > { %v215_v15 = vpack.c.bf16 %v214_v14, %v214_v14  ;;  %v903_v17 = vld [vmem:[#allocation5 + $0x1c] ss:$12 sps:$4 sm:$0xff]   ;;  %v904_v18 = vld [vmem:[#allocation5 + $0x4] ss:$12 sps:$4 sm:$0xff]   ;;  %v907_v21 = vld [vmem:[#allocation5 + $0x80] ss:$12 sps:$4 sm:$0xff]   ;;  %s1266_s29 = scalar_lea.hbm %s1306_s3, %s728_s18 }
  0x5c   : > { %761 = vmatpush3.bf16.msra.mxu0 %v890_v2  ;;  %781 = vmatpush3.bf16.msra.mxu1 %v898_v6  ;;  %v905_v19 = vld [vmem:[#allocation5 + $0xb0] ss:$12 sps:$4 sm:$0xff]   ;;  %v906_v20 = vld [vmem:[#allocation5 + $0x98] ss:$12 sps:$4 sm:$0xff]   ;;  %v908_v22 = vld [vmem:[#allocation5 + $0x68] ss:$12 sps:$4 sm:$0xff]  }
  0x5d   : > { %762 = vmatprep.subr.bf16.mxu0 %v1072_v0  ;;  %782 = vmatprep.subr.bf16.mxu1 %v1072_v0  ;;  %v909_v23 = vld [vmem:[#allocation5 + $0x50] ss:$12 sps:$4 sm:$0xff]   ;;  %v695_v24 = vld [vmem:[#allocation7] ss:$0 sm:$0xff]  ;;  %v704_v25 = vld [vmem:[#allocation7 + $0x1] ss:$0 sm:$0xff] }
  0x5e   : > { %v705_v28 = vld [vmem:[#allocation7 + $0x2] ss:$0 sm:$0xff]  ;;  %v910_v36 = vld [vmem:[#allocation5 + $0x38] ss:$12 sps:$4 sm:$0xff]   ;;  %v912_v38 = vld [vmem:[#allocation5 + $0x8] ss:$12 sps:$4 sm:$0xff]  }
  0x5f   : > { %v911_v37 = vld [vmem:[#allocation5 + $0x20] ss:$12 sps:$4 sm:$0xff]   ;;  %v716_v43 = vld [vmem:[#allocation7 + $0x5] ss:$0 sm:$0xff]  ;;  %v725_v51 = vld [vmem:[#allocation7 + $0x6] ss:$0 sm:$0xff] }
  0x60   : > { %763 = vmatpush3.bf16.msra.mxu0 %v891_v3  ;;  %783 = vmatpush3.bf16.msra.mxu1 %v899_v8  ;;  %v706_v39 = vld [vmem:[#allocation7 + $0x3] ss:$0 sm:$0xff]  ;;  %s212_s20 = scalar_lea.vmem [#allocation8], %s691_s26  ;;  %vm578_vm1 = vcmask 64512   ;;  %s581_s5 = scalar_lea.sflag [#allocation4], %s1213_s24 }
  0x61   : > { %764 = vmatprep.subr.bf16.mxu0 %v1072_v0  ;;  %784 = vmatprep.subr.bf16.mxu1 %v1072_v0  ;;  %s594_s25 = sshll.u32 %s212_s20, 4  ;;  %p1322_p0 = scmp.ne.s32.totalorder %s1316_s10, 0  ;;  %s595_s25 = int_to_ptr.vmem [resolvable:$true] %s594_s25 }
  0x62   : > { %s997_s6 = scalar_lea.vmem %s595_s25, 128  ;;  %s1074_s8 = smov [#allocation8]  }
  0x63   : > { %p998_p11 = scmp.ne.s32.totalorder %s595_s25, %s997_s6  ;;  %s1001_s16 = sshll.u32 %s1074_s8, 4  ;;  %s1002_s16 = int_to_ptr.vmem [resolvable:$false] %s1001_s16 }
  0x64   : > { %765 = vmatpush3.bf16.msra.mxu0 %v892_v5  ;;  %785 = vmatpush3.bf16.msra.mxu1 %v900_v10  ;;  %s1003_s9 = scalar_lea.vmem %s1002_s16, 256  ;;  %p1004_p6 = scmp.lt.s32.totalorder %s595_s25, %s1002_s16 }
  0x65   : > { %766 = vmatprep.subr.bf16.mxu0 %v1072_v0  ;;  %786 = vmatprep.subr.bf16.mxu1 %v1072_v0  ;;  %p999_p1 = pnand %p998_p11, %p1322_p0  ;;  %p1005_p12 = scmp.lt.s32.totalorder %s1003_s9, %s997_s6 }
  0x67   : > { %p1000_p2 = pneg %p999_p1  ;;  %p1006_p7 = por %p1005_p12, %p1004_p6 }
  0x68   : > { %767 = vmatpush3.bf16.msra.mxu0 %v893_v7  ;;  %787 = vmatpush3.bf16.msra.mxu1 %v901_v12 }
  0x69   : > { %768 = vmatprep.subr.bf16.mxu0 %v1072_v0  ;;  %788 = vmatprep.subr.bf16.mxu1 %v1072_v0  ;;  %p1007_p9 = pnand %p1006_p7, %p1000_p2 }
  0x6c   : > { %769 = vmatpush3.bf16.msra.mxu0 %v894_v9  ;;  %789 = vmatpush3.bf16.msra.mxu1 %v902_v16 }
  0x6d   : > { %770 = vmatprep.subr.bf16.mxu0 %v1072_v0  ;;  %790 = vmatprep.subr.bf16.mxu1 %v1072_v0 }
  0x70   : > { %771 = vmatpush3.bf16.msra.mxu0 %v895_v11  ;;  %791 = vmatpush3.bf16.msra.mxu1 %v903_v17 }
  0x71   : > { %772 = vmatprep.subr.bf16.mxu0 %v1072_v0  ;;  %792 = vmatprep.subr.bf16.mxu1 %v1072_v0 }
  0x74   : > { %773 = vmatpush3.bf16.msra.mxu0 %v896_v13  ;;  %793 = vmatpush3.bf16.msra.mxu1 %v904_v18 }
  0x75   : > { %798 = vmatprep.subr.bf16.mxu0 %v1072_v0 }
  0x77   : > { %775 = vmatmul.mubr.bf16.vlgmr.msra.gmra.mxu0 %v215_v15 }
  0x78   : > { %814 = vmatprep.mubr.msk.bf16.mxu0 %vm1073_vm0, %v1072_v0  ;;  %799 = vmatpush3.bf16.msra.mxu0 %v905_v19 }
  0x79   : > { %800 = vmatprep.subr.bf16.mxu0 %v1072_v0 }
  0x7c   : > { %801 = vmatpush3.bf16.msra.mxu0 %v906_v20 }
  0x7d   : > { %802 = vmatprep.subr.bf16.mxu0 %v1072_v0 }
  0x80   : > { %803 = vmatpush3.bf16.msra.mxu0 %v907_v21 }
  0x81   : > { %804 = vmatprep.subr.bf16.mxu0 %v1072_v0 }
  0x84   : > { %805 = vmatpush3.bf16.msra.mxu0 %v908_v22 }
  0x85   : > { %806 = vmatprep.subr.bf16.mxu0 %v1072_v0 }
  0x88   : > { %807 = vmatpush3.bf16.msra.mxu0 %v909_v23 }
  0x89   : > { %808 = vmatprep.subr.bf16.mxu0 %v1072_v0 }
  0x8c   : > { %809 = vmatpush3.bf16.msra.mxu0 %v910_v36 }
  0x8d   : > { %810 = vmatprep.subr.bf16.mxu0 %v1072_v0 }
  0x90   : > { %811 = vmatpush3.bf16.msra.mxu0 %v911_v37 }
  0x91   : > { %812 = vmatprep.subr.bf16.mxu0 %v1072_v0 }
  0x94   : > { %813 = vmatpush3.bf16.msra.mxu0 %v912_v38 }
 0x137   : > { %v357_v26 = vpop.f32.mrf.mxu0 }
 0x138   : > { %v358_v27 = vadd.f32 %v695_v24, %v357_v26 }
 0x139   : > { %v776_v29 = vpop.f32.mrf.mxu0 }
 0x13a   : > { %v367_v30 = vmul.f32 %v704_v25, %v358_v27 }
 0x13b   : > { %v360_v31 = vpop.f32.mrf.mxu0 }
 0x13c   : > { %v372_v32 = vadd.f32 %v705_v28, %v367_v30 }
 0x13d   : > { %v777_v33 = vpop.f32.mrf.mxu0 }
 0x13e   : > { %v373_v34 = vmax.f32 %v372_v32, 0.0 }
 0x140   : > { %v374_v35 = vpack.c.bf16 %v373_v34, %v373_v34 }
 0x142   : > { %795 = vmatmul.mubr.bf16.vlgmr.msra.gmra.mxu1 %v374_v35 }
 0x202   : > { %v461_v41 = vpop.f32.mrf.mxu1 }
 0x203   : > { %v462_v42 = vadd.f32 %v706_v39, %v461_v41 }
 0x204   : > { %v796_v44 = vpop.f32.mrf.mxu1 }
 0x205   : > { %v471_v45 = vmul.f32 %v715_v40, %v462_v42 }
 0x206   : > { %v464_v46 = vpop.f32.mrf.mxu1 }
 0x207   : > { %v476_v47 = vadd.f32 %v716_v43, %v471_v45 }
 0x208   : > { %v797_v48 = vpop.f32.mrf.mxu1 }
 0x209   : > { %v477_v49 = vmax.f32 %v476_v47, 0.0 }
 0x20b   : > { %v478_v50 = vpack.c.bf16 %v477_v49, %v477_v49 }
 0x20d   : > { %815 = vmatmul.mubr.bf16.vlgmr.msra.gmra.mxu0 %v478_v50 }
 0x2cd   : > { %v561_v52 = vpop.f32.mrf.mxu0 }
 0x2ce   : > { %v571_v53 = vadd.f32 %v725_v51, %v561_v52 }
 0x2cf   : > { %v816_v54 = vpop.f32.mrf.mxu0 }
 0x2d0   : > { %v726_v55 = vmul.f32 -1.442695, %v571_v53 }
 0x2d1   : > { %v564_v56 = vpop.f32.mrf.mxu0 }
 0x2d2   : > { %913 = vpow2.f32 %v726_v55 }
 0x2d3   : > { %v817_v57 = vpop.f32.mrf.mxu0 }
 0x2df   : > { %v914_v58 = vpop.eup %913 }
 0x2e0   : > { %v575_v59 = vadd.f32 1.0, %v914_v58 }
 0x2e2   : > { %915 = vrcp.f32 %v575_v59 }
 0x2ef   : > { %v916_v60 = vpop.eup %915 }
 0x2f0   : > { %579 = vst.msk [vmem:[%s212_s20] sm:$0xff] %vm578_vm1, %v916_v60 }
 0x2f1   : > { %1010 = shalt.err (!%p1007_p9)
}
 0x2f2   : > { %s1011_s21 = scalar_lea.hbm %s1266_s29, 128  ;;  %s1015_s23 = scalar_lea.hbm %s1306_s3, 256 }
 0x2f3   : > { %p1012_p13 = scmp.ne.s32.totalorder %s1266_s29, %s1011_s21  ;;  %p1016_p4 = scmp.lt.s32.totalorder %s1266_s29, %s1306_s3 }
 0x2f4   : > { %p1017_p8 = scmp.lt.s32.totalorder %s1015_s23, %s1011_s21 }
 0x2f5   : > { %p1013_p5 = pnand %p1012_p13, %p1322_p0 }
 0x2f6   : > { %p1018_p3 = por %p1017_p8, %p1016_p4 }
 0x2f7   : > { %p1014_p10 = pneg %p1013_p5 }
 0x2f9   : > { %p1019_p11 = pnand %p1018_p3, %p1014_p10 }
 0x2fb   : > { %1022 = shalt.err (!%p1019_p11)
}
 0x2fc   : > { %828 = dma.vmem_to_hbm [thread:$0]  (%p1322_p0), %s595_s25, 128, %s1266_s29, %s581_s5  }
 0x2fd PF: > { %s606_s30 = sand.u32 1, %s1053_s12   ;;  %p1323_p1 = scmp.ne.s32.totalorder %s1312_s19, 0 }
 0x2fe   : > { %p1324_p2 = scmp.ge.s32.totalorder %s1065_s15, 2  ;;  %s607_s4 = scalar_lea.sflag [#allocation4], %s606_s30 }
 0x300   : > { %p842_p6 = pnand %p1324_p2, %p1323_p1 }
 0x302   : > { %p843_p12 = pneg %p842_p6 }
 0x304   : > { %1048 = dma.done.wait (%p843_p12), %s607_s4, 128  }
 0x305   : > { %1050 = vsyncadd (%p843_p12), %s607_s4, 4294967168  ;;  %p17_p7 = scmp.ge.s32.totalorder %s1167_s7, 4   ;;  %s1325_s12 = smov %s1057_s13 }
 0x306   : > { %s1326_s13 = smov %s1061_s14  ;;  %s1327_s14 = smov %s1183_s11 }
 0x307   : > { %s1328_s15 = smov %s1167_s7  ;;  %19 = sbr.rel (!%p17_p7) target bundleno = 6 (0x6), region = 85 }
 0x30c   :  { %612 = vsyncpa [#allocation3], 1 }
 0x30d   :  { %614 = vsyncpa [#allocation3 + $0x1], 1 }
 0x30e   :  { %615 = vsyncpa [#allocation6], 1 }
 0x30f   :  { %616 = vsyncpa [#allocation4], 1 }
 0x310   :  { %618 = vsyncpa [#allocation4 + $0x1], 1 }

</bundles_post_ra>
